<compile_context>
chip_gen: v7x
topology: tpu7x:2x2x1
jax: 0.10.0
libtpu: 0.0.40
codegen_flags: <defaults>
</compile_context>

<pallas_src>
import functools

import jax
import jax.numpy as jnp
from jax import lax
from jax.experimental import pallas as pl
from jax.experimental.pallas import tpu as pltpu

PAD = 128  # lane-dim padding for all feature dimensions


# ------------------------------ fused forward kernel ------------------------------ #
def gcnet_kernel(x_ref, a_ref, wroot_ref, wrel_ref, b_ref, wdec_ref, wlin_ref, o_ref,
                 *, num_layers, num_dec, out_dim):
    n = x_ref.shape[0]                               # real node count (no row padding)
    x = x_ref[...]                                   # [N, PAD]  bf16
    a = a_ref[...]                                   # [N, N]    bf16

    # which layer outputs a later residual will consume: i-2 for every firing layer i
    needed = {i - 2 for i in range(num_layers) if i > 2 and (i - 1) % 2 == 0}
    kept = {}

    # ---- GraphConv stack (unrolled; everything stays in vregs/VMEM) ----
    h = None
    for l in range(num_layers):
        agg = jnp.dot(a, x, preferred_element_type=jnp.float32)        # A @ x  [N, PAD] f32
        agg = agg.astype(jnp.bfloat16)
        # two K=128 MXU dots, no concat materialization
        h = (jnp.dot(x, wroot_ref[l], preferred_element_type=jnp.float32)
             + jnp.dot(agg, wrel_ref[l], preferred_element_type=jnp.float32)
             + b_ref[l])                                                # [N, PAD] f32
        h = jnp.maximum(h, 0.01 * h)                 # leaky_relu(0.01), f32 on VPU
        if l > 2 and (l - 1) % 2 == 0:               # residual from layer l-2 (post-act)
            h = h + kept[l - 2]
        if l in needed:
            kept[l] = h
        x = h.astype(jnp.bfloat16)                   # bf16 only at the matmul boundary

    # ---- global_mean_pool over the real node count (f32) ----
    g = jnp.sum(h, axis=0, keepdims=True) * (1.0 / n)                   # [1, PAD] f32

    # ---- decoder: Linear(no bias) + leaky_relu(0.001); dropout is identity in eval ----
    for d in range(num_dec):
        g = jnp.dot(g.astype(jnp.bfloat16), wdec_ref[d],
                    preferred_element_type=jnp.float32)
        g = jnp.maximum(g, 0.001 * g)

    # ---- head: Linear(no bias) + softmax over the real out_dim columns ----
    logits = jnp.dot(g.astype(jnp.bfloat16), wlin_ref[...],
                     preferred_element_type=jnp.float32)                # [1, PAD] f32
    col = lax.broadcasted_iota(jnp.int32, logits.shape, 1)
    valid = col < out_dim
    logits = jnp.where(valid, logits, -1e30)         # mask padded lanes out of softmax
    m = jnp.max(logits, axis=-1, keepdims=True)
    e = jnp.where(valid, jnp.exp(logits - m), 0.0)
    s = jnp.sum(e, axis=-1, keepdims=True)
    o_ref[...] = e / s                               # exact divide (parity with torch)


# --------------------------------- params & padding -------------------------------- #
def _pad2(w, rows, cols, dtype=jnp.float32):
    out = jnp.zeros((rows, cols), dtype)
    return out.at[:w.shape[0], :w.shape[1]].set(w.astype(dtype))


def init_gcnet_params(key, input_dim, hidden_dims, decoder_dims, output_dim, pad=PAD):
    dims = [input_dim] + list(hidden_dims)
    assert max(dims + list(decoder_dims) + [output_dim]) <= pad

    w_root, w_rel, b_gc = [], [], []
    for i in range(len(hidden_dims)):
        key, k1, k2, k3 = jax.random.split(key, 4)
        fi, fo = dims[i], dims[i + 1]
        s = 1.0 / jnp.sqrt(fi)
        wr = jax.random.uniform(k1, (fi, fo), jnp.float32, -s, s)
        wl = jax.random.uniform(k2, (fi, fo), jnp.float32, -s, s)
        b = jax.random.uniform(k3, (1, fo), jnp.float32, -s, s)
        w_root.append(_pad2(wr, pad, pad, jnp.bfloat16))                 # [pad, pad] bf16
        w_rel.append(_pad2(wl, pad, pad, jnp.bfloat16))                  # [pad, pad] bf16
        b_gc.append(_pad2(b, 1, pad))                                    # [1, pad]   f32

    decdims = [hidden_dims[-1]] + list(decoder_dims)
    w_dec = []
    for i in range(len(decdims) - 1):
        key, k1 = jax.random.split(key)
        s = 1.0 / jnp.sqrt(decdims[i])
        w = jax.random.uniform(k1, (decdims[i], decdims[i + 1]), jnp.float32, -s, s)
        w_dec.append(_pad2(w, pad, pad, jnp.bfloat16))

    key, k1 = jax.random.split(key)
    s = 1.0 / jnp.sqrt(decdims[-1])
    w_lin = jax.random.uniform(k1, (decdims[-1], output_dim), jnp.float32, -s, s)

    return {
        "w_root": jnp.stack(w_root),                      # [L, pad, pad] bf16
        "w_rel": jnp.stack(w_rel),                        # [L, pad, pad] bf16
        "b_gc": jnp.stack(b_gc),                          # [L, 1, pad]   f32
        "w_dec": jnp.stack(w_dec),                        # [D, pad, pad] bf16
        "w_lin": _pad2(w_lin, pad, pad, jnp.bfloat16),    # [pad, pad]    bf16
    }


# ------------------------------------ forward -------------------------------------- #
def gcnet_forward(params, x, adj, output_dim):
    """x: [B, N, input_dim] (or [N, input_dim]) node features,
       adj: [B, N, N] (or [N, N]) dense adjacency with A[dst, src] = 1."""
    # TODO(synk): training-mode dropout (p=0.5) not implemented; module runs in eval mode
    # (the `x = x * 2` branch in the original is a dead string literal; TopKPooling with
    # ratio=1 is never called in forward).
    single = (x.ndim == 2)
    if single:
        x, adj = x[None], adj[None]
    bsz, n, fin = x.shape
    num_layers = params["w_root"].shape[0]
    num_dec = params["w_dec"].shape[0]

    x_pad = jnp.zeros((bsz, n, PAD), jnp.bfloat16).at[:, :, :fin].set(x.astype(jnp.bfloat16))
    adj_bf = adj.astype(jnp.bfloat16)

    flops = bsz * (num_layers * (2 * n * n * PAD + 2 * 2 * n * PAD * PAD)
                   + (num_dec + 1) * 2 * PAD * PAD)
    bytes_acc = (2 * (x_pad.size + adj_bf.size)
                 + 2 * (params["w_root"].size + params["w_rel"].size
                        + params["w_dec"].size + params["w_lin"].size)
                 + 4 * params["b_gc"].size + 4 * bsz * PAD)
    ce = pl.CostEstimate(flops=int(flops), transcendentals=int(bsz * PAD),
                         bytes_accessed=int(bytes_acc))

    kern = functools.partial(gcnet_kernel, num_layers=num_layers,
                             num_dec=num_dec, out_dim=output_dim)

    const3 = lambda b: (0, 0, 0)
    out = pl.pallas_call(
        kern,
        grid=(bsz,),
        out_shape=jax.ShapeDtypeStruct((bsz, 1, PAD), jnp.float32),
        in_specs=[
            pl.BlockSpec((None, n, PAD), lambda b: (b, 0, 0)),   # x: one graph per step
            pl.BlockSpec((None, n, n), lambda b: (b, 0, 0)),     # adj: one graph per step
            pl.BlockSpec(params["w_root"].shape, const3),        # weights: VMEM-resident,
            pl.BlockSpec(params["w_rel"].shape, const3),         # constant index_map ->
            pl.BlockSpec(params["b_gc"].shape, const3),          # DMA'd once across grid
            pl.BlockSpec(params["w_dec"].shape, const3),
            pl.BlockSpec(params["w_lin"].shape, lambda b: (0, 0)),
        ],
        out_specs=pl.BlockSpec((None, 1, PAD), lambda b: (b, 0, 0)),
        compiler_params=pltpu.CompilerParams(dimension_semantics=("parallel",)),
        cost_estimate=ce,
    )(x_pad, adj_bf, params["w_root"], params["w_rel"], params["b_gc"],
      params["w_dec"], params["w_lin"])

    probs = out[:, 0, :output_dim]                    # squeeze + drop lane padding
    return probs[0] if single else probs


if __name__ == "__main__":
    key = jax.random.PRNGKey(0)

    # small synthetic problem: a batch of graphs, each processed as one grid step
    B = 4
    N = 16
    input_dim = 16
    hidden_dims = [32, 32, 32, 32]   # 4 layers so the i==3 residual branch fires
    decoder_dims = [16]
    output_dim = 8

    key, kx = jax.random.split(key)
    x = jax.random.normal(kx, (B, N, input_dim), jnp.float32)

    # deterministic edge_index: ring graph + a few chords, converted to dense adjacency
    src = jnp.concatenate([jnp.arange(N), jnp.array([0, 3, 7, 11])])
    dst = jnp.concatenate([(jnp.arange(N) + 1) % N, jnp.array([8, 12, 1, 5])])
    adj1 = jnp.zeros((N, N), jnp.float32).at[dst, src].add(1.0)   # A[dst, src] = 1
    adj = jnp.broadcast_to(adj1, (B, N, N))

    params = init_gcnet_params(key, input_dim, hidden_dims, decoder_dims, output_dim)

    out = gcnet_forward(params, x, adj, output_dim)
    jax.block_until_ready(out)

    assert out.shape == (B, output_dim)
    assert bool(jnp.isfinite(out).all())
    assert bool(jnp.allclose(out.sum(axis=-1), 1.0, atol=1e-3))   # softmax rows sum to 1
    print("KERNEL_OK")
</pallas_src>

<mosaic_0001>
module attributes {stable_mosaic.version = 11 : i64} {
  func.func @gcnet_kernel(%arg0: i32, %arg1: memref<1x16x128xbf16, #tpu.memory_space<vmem>>, %arg2: memref<1x16x16xbf16, #tpu.memory_space<vmem>>, %arg3: memref<4x128x128xbf16, #tpu.memory_space<vmem>>, %arg4: memref<4x128x128xbf16, #tpu.memory_space<vmem>>, %arg5: memref<4x1x128xf32, #tpu.memory_space<vmem>>, %arg6: memref<1x128x128xbf16, #tpu.memory_space<vmem>>, %arg7: memref<128x128xbf16, #tpu.memory_space<vmem>>, %arg8: memref<1x1x128xf32, #tpu.memory_space<vmem>>) attributes {dimension_semantics = [#tpu.dimension_semantics<parallel>], iteration_bounds = array<i64: 4>, scalar_prefetch = 0 : i64, scratch_operands = 0 : i64, tpu.core_type = #tpu.core_type<tc>, window_params = [{transform_indices = @transform_0, window_bounds = array<i64: 1, 16, 128>}, {transform_indices = @transform_1, window_bounds = array<i64: 1, 16, 16>}, {pipeline_mode = #tpu.pipeline_mode<synchronous>, transform_indices = @transform_2, window_bounds = array<i64: 4, 128, 128>}, {pipeline_mode = #tpu.pipeline_mode<synchronous>, transform_indices = @transform_3, window_bounds = array<i64: 4, 128, 128>}, {pipeline_mode = #tpu.pipeline_mode<synchronous>, transform_indices = @transform_4, window_bounds = array<i64: 4, 1, 128>}, {pipeline_mode = #tpu.pipeline_mode<synchronous>, transform_indices = @transform_5, window_bounds = array<i64: 1, 128, 128>}, {pipeline_mode = #tpu.pipeline_mode<synchronous>, transform_indices = @transform_6, window_bounds = array<i64: 128, 128>}, {transform_indices = @transform_7, window_bounds = array<i64: 1, 1, 128>}]} {
    %c0 = arith.constant 0 : index
    %c0_0 = arith.constant 0 : index
    %c0_1 = arith.constant 0 : index
    %0 = vector.load %arg1[%c0, %c0_0, %c0_1] : memref<1x16x128xbf16, #tpu.memory_space<vmem>>, vector<1x16x128xbf16>
    %1 = vector.shape_cast %0 : vector<1x16x128xbf16> to vector<16x128xbf16>
    %c0_2 = arith.constant 0 : index
    %c0_3 = arith.constant 0 : index
    %c0_4 = arith.constant 0 : index
    %2 = vector.load %arg2[%c0_2, %c0_3, %c0_4] : memref<1x16x16xbf16, #tpu.memory_space<vmem>>, vector<1x16x16xbf16>
    %3 = vector.shape_cast %2 : vector<1x16x16xbf16> to vector<16x16xbf16>
    %cst = arith.constant dense<0.000000e+00> : vector<16x128xf32>
    %4 = tpu.matmul %3, %1, %cst {dimension_numbers = #tpu.dot_dimension_numbers<[1], [0], [0], [1], [0, 0, 1, 1], [], []>} : vector<16x16xbf16>, vector<16x128xbf16>, vector<16x128xf32> -> vector<16x128xf32>
    %5 = arith.truncf %4 : vector<16x128xf32> to vector<16x128xbf16>
    %c0_5 = arith.constant 0 : index
    %c0_6 = arith.constant 0 : index
    %c0_7 = arith.constant 0 : index
    %6 = vector.load %arg3[%c0_5, %c0_6, %c0_7] : memref<4x128x128xbf16, #tpu.memory_space<vmem>>, vector<1x128x128xbf16>
    %7 = vector.shape_cast %6 : vector<1x128x128xbf16> to vector<128x128xbf16>
    %cst_8 = arith.constant dense<0.000000e+00> : vector<16x128xf32>
    %8 = tpu.matmul %1, %7, %cst_8 {dimension_numbers = #tpu.dot_dimension_numbers<[1], [0], [0], [1], [0, 0, 1, 1], [], []>} : vector<16x128xbf16>, vector<128x128xbf16>, vector<16x128xf32> -> vector<16x128xf32>
    %c0_9 = arith.constant 0 : index
    %c0_10 = arith.constant 0 : index
    %c0_11 = arith.constant 0 : index
    %9 = vector.load %arg4[%c0_9, %c0_10, %c0_11] : memref<4x128x128xbf16, #tpu.memory_space<vmem>>, vector<1x128x128xbf16>
    %10 = vector.shape_cast %9 : vector<1x128x128xbf16> to vector<128x128xbf16>
    %cst_12 = arith.constant dense<0.000000e+00> : vector<16x128xf32>
    %11 = tpu.matmul %5, %10, %cst_12 {dimension_numbers = #tpu.dot_dimension_numbers<[1], [0], [0], [1], [0, 0, 1, 1], [], []>} : vector<16x128xbf16>, vector<128x128xbf16>, vector<16x128xf32> -> vector<16x128xf32>
    %12 = arith.addf %8, %11 : vector<16x128xf32>
    %c0_13 = arith.constant 0 : index
    %c0_14 = arith.constant 0 : index
    %c0_15 = arith.constant 0 : index
    %13 = vector.load %arg5[%c0_13, %c0_14, %c0_15] : memref<4x1x128xf32, #tpu.memory_space<vmem>>, vector<1x1x128xf32>
    %14 = vector.shape_cast %13 : vector<1x1x128xf32> to vector<1x128xf32>
    %15 = vector.broadcast %14 : vector<1x128xf32> to vector<16x128xf32>
    %16 = arith.addf %12, %15 : vector<16x128xf32>
    %cst_16 = arith.constant 0.00999999977 : f32
    %17 = vector.broadcast %cst_16 : f32 to vector<16x128xf32>
    %18 = arith.mulf %17, %16 : vector<16x128xf32>
    %19 = arith.maximumf %16, %18 : vector<16x128xf32>
    %20 = arith.truncf %19 : vector<16x128xf32> to vector<16x128xbf16>
    %cst_17 = arith.constant dense<0.000000e+00> : vector<16x128xf32>
    %21 = tpu.matmul %3, %20, %cst_17 {dimension_numbers = #tpu.dot_dimension_numbers<[1], [0], [0], [1], [0, 0, 1, 1], [], []>} : vector<16x16xbf16>, vector<16x128xbf16>, vector<16x128xf32> -> vector<16x128xf32>
    %22 = arith.truncf %21 : vector<16x128xf32> to vector<16x128xbf16>
    %c1 = arith.constant 1 : index
    %c0_18 = arith.constant 0 : index
    %c0_19 = arith.constant 0 : index
    %23 = vector.load %arg3[%c1, %c0_18, %c0_19] : memref<4x128x128xbf16, #tpu.memory_space<vmem>>, vector<1x128x128xbf16>
    %24 = vector.shape_cast %23 : vector<1x128x128xbf16> to vector<128x128xbf16>
    %cst_20 = arith.constant dense<0.000000e+00> : vector<16x128xf32>
    %25 = tpu.matmul %20, %24, %cst_20 {dimension_numbers = #tpu.dot_dimension_numbers<[1], [0], [0], [1], [0, 0, 1, 1], [], []>} : vector<16x128xbf16>, vector<128x128xbf16>, vector<16x128xf32> -> vector<16x128xf32>
    %c1_21 = arith.constant 1 : index
    %c0_22 = arith.constant 0 : index
    %c0_23 = arith.constant 0 : index
    %26 = vector.load %arg4[%c1_21, %c0_22, %c0_23] : memref<4x128x128xbf16, #tpu.memory_space<vmem>>, vector<1x128x128xbf16>
    %27 = vector.shape_cast %26 : vector<1x128x128xbf16> to vector<128x128xbf16>
    %cst_24 = arith.constant dense<0.000000e+00> : vector<16x128xf32>
    %28 = tpu.matmul %22, %27, %cst_24 {dimension_numbers = #tpu.dot_dimension_numbers<[1], [0], [0], [1], [0, 0, 1, 1], [], []>} : vector<16x128xbf16>, vector<128x128xbf16>, vector<16x128xf32> -> vector<16x128xf32>
    %29 = arith.addf %25, %28 : vector<16x128xf32>
    %c1_25 = arith.constant 1 : index
    %c0_26 = arith.constant 0 : index
    %c0_27 = arith.constant 0 : index
    %30 = vector.load %arg5[%c1_25, %c0_26, %c0_27] : memref<4x1x128xf32, #tpu.memory_space<vmem>>, vector<1x1x128xf32>
    %31 = vector.shape_cast %30 : vector<1x1x128xf32> to vector<1x128xf32>
    %32 = vector.broadcast %31 : vector<1x128xf32> to vector<16x128xf32>
    %33 = arith.addf %29, %32 : vector<16x128xf32>
    %cst_28 = arith.constant 0.00999999977 : f32
    %34 = vector.broadcast %cst_28 : f32 to vector<16x128xf32>
    %35 = arith.mulf %34, %33 : vector<16x128xf32>
    %36 = arith.maximumf %33, %35 : vector<16x128xf32>
    %37 = arith.truncf %36 : vector<16x128xf32> to vector<16x128xbf16>
    %cst_29 = arith.constant dense<0.000000e+00> : vector<16x128xf32>
    %38 = tpu.matmul %3, %37, %cst_29 {dimension_numbers = #tpu.dot_dimension_numbers<[1], [0], [0], [1], [0, 0, 1, 1], [], []>} : vector<16x16xbf16>, vector<16x128xbf16>, vector<16x128xf32> -> vector<16x128xf32>
    %39 = arith.truncf %38 : vector<16x128xf32> to vector<16x128xbf16>
    %c2 = arith.constant 2 : index
    %c0_30 = arith.constant 0 : index
    %c0_31 = arith.constant 0 : index
    %40 = vector.load %arg3[%c2, %c0_30, %c0_31] : memref<4x128x128xbf16, #tpu.memory_space<vmem>>, vector<1x128x128xbf16>
    %41 = vector.shape_cast %40 : vector<1x128x128xbf16> to vector<128x128xbf16>
    %cst_32 = arith.constant dense<0.000000e+00> : vector<16x128xf32>
    %42 = tpu.matmul %37, %41, %cst_32 {dimension_numbers = #tpu.dot_dimension_numbers<[1], [0], [0], [1], [0, 0, 1, 1], [], []>} : vector<16x128xbf16>, vector<128x128xbf16>, vector<16x128xf32> -> vector<16x128xf32>
    %c2_33 = arith.constant 2 : index
    %c0_34 = arith.constant 0 : index
    %c0_35 = arith.constant 0 : index
    %43 = vector.load %arg4[%c2_33, %c0_34, %c0_35] : memref<4x128x128xbf16, #tpu.memory_space<vmem>>, vector<1x128x128xbf16>
    %44 = vector.shape_cast %43 : vector<1x128x128xbf16> to vector<128x128xbf16>
    %cst_36 = arith.constant dense<0.000000e+00> : vector<16x128xf32>
    %45 = tpu.matmul %39, %44, %cst_36 {dimension_numbers = #tpu.dot_dimension_numbers<[1], [0], [0], [1], [0, 0, 1, 1], [], []>} : vector<16x128xbf16>, vector<128x128xbf16>, vector<16x128xf32> -> vector<16x128xf32>
    %46 = arith.addf %42, %45 : vector<16x128xf32>
    %c2_37 = arith.constant 2 : index
    %c0_38 = arith.constant 0 : index
    %c0_39 = arith.constant 0 : index
    %47 = vector.load %arg5[%c2_37, %c0_38, %c0_39] : memref<4x1x128xf32, #tpu.memory_space<vmem>>, vector<1x1x128xf32>
    %48 = vector.shape_cast %47 : vector<1x1x128xf32> to vector<1x128xf32>
    %49 = vector.broadcast %48 : vector<1x128xf32> to vector<16x128xf32>
    %50 = arith.addf %46, %49 : vector<16x128xf32>
    %cst_40 = arith.constant 0.00999999977 : f32
    %51 = vector.broadcast %cst_40 : f32 to vector<16x128xf32>
    %52 = arith.mulf %51, %50 : vector<16x128xf32>
    %53 = arith.maximumf %50, %52 : vector<16x128xf32>
    %54 = arith.truncf %53 : vector<16x128xf32> to vector<16x128xbf16>
    %cst_41 = arith.constant dense<0.000000e+00> : vector<16x128xf32>
    %55 = tpu.matmul %3, %54, %cst_41 {dimension_numbers = #tpu.dot_dimension_numbers<[1], [0], [0], [1], [0, 0, 1, 1], [], []>} : vector<16x16xbf16>, vector<16x128xbf16>, vector<16x128xf32> -> vector<16x128xf32>
    %56 = arith.truncf %55 : vector<16x128xf32> to vector<16x128xbf16>
    %c3 = arith.constant 3 : index
    %c0_42 = arith.constant 0 : index
    %c0_43 = arith.constant 0 : index
    %57 = vector.load %arg3[%c3, %c0_42, %c0_43] : memref<4x128x128xbf16, #tpu.memory_space<vmem>>, vector<1x128x128xbf16>
    %58 = vector.shape_cast %57 : vector<1x128x128xbf16> to vector<128x128xbf16>
    %cst_44 = arith.constant dense<0.000000e+00> : vector<16x128xf32>
    %59 = tpu.matmul %54, %58, %cst_44 {dimension_numbers = #tpu.dot_dimension_numbers<[1], [0], [0], [1], [0, 0, 1, 1], [], []>} : vector<16x128xbf16>, vector<128x128xbf16>, vector<16x128xf32> -> vector<16x128xf32>
    %c3_45 = arith.constant 3 : index
    %c0_46 = arith.constant 0 : index
    %c0_47 = arith.constant 0 : index
    %60 = vector.load %arg4[%c3_45, %c0_46, %c0_47] : memref<4x128x128xbf16, #tpu.memory_space<vmem>>, vector<1x128x128xbf16>
    %61 = vector.shape_cast %60 : vector<1x128x128xbf16> to vector<128x128xbf16>
    %cst_48 = arith.constant dense<0.000000e+00> : vector<16x128xf32>
    %62 = tpu.matmul %56, %61, %cst_48 {dimension_numbers = #tpu.dot_dimension_numbers<[1], [0], [0], [1], [0, 0, 1, 1], [], []>} : vector<16x128xbf16>, vector<128x128xbf16>, vector<16x128xf32> -> vector<16x128xf32>
    %63 = arith.addf %59, %62 : vector<16x128xf32>
    %c3_49 = arith.constant 3 : index
    %c0_50 = arith.constant 0 : index
    %c0_51 = arith.constant 0 : index
    %64 = vector.load %arg5[%c3_49, %c0_50, %c0_51] : memref<4x1x128xf32, #tpu.memory_space<vmem>>, vector<1x1x128xf32>
    %65 = vector.shape_cast %64 : vector<1x1x128xf32> to vector<1x128xf32>
    %66 = vector.broadcast %65 : vector<1x128xf32> to vector<16x128xf32>
    %67 = arith.addf %63, %66 : vector<16x128xf32>
    %cst_52 = arith.constant 0.00999999977 : f32
    %68 = vector.broadcast %cst_52 : f32 to vector<16x128xf32>
    %69 = arith.mulf %68, %67 : vector<16x128xf32>
    %70 = arith.maximumf %67, %69 : vector<16x128xf32>
    %71 = arith.addf %70, %36 : vector<16x128xf32>
    %cst_53 = arith.constant dense<0.000000e+00> : vector<128xf32>
    %72 = vector.multi_reduction <add>, %71, %cst_53 [0] : vector<16x128xf32> to vector<128xf32>
    %73 = vector.shape_cast %72 : vector<128xf32> to vector<1x128xf32>
    %cst_54 = arith.constant 6.250000e-02 : f32
    %74 = vector.broadcast %cst_54 : f32 to vector<1x128xf32>
    %75 = arith.mulf %73, %74 : vector<1x128xf32>
    %76 = arith.truncf %75 : vector<1x128xf32> to vector<1x128xbf16>
    %c0_55 = arith.constant 0 : index
    %c0_56 = arith.constant 0 : index
    %c0_57 = arith.constant 0 : index
    %77 = vector.load %arg6[%c0_55, %c0_56, %c0_57] : memref<1x128x128xbf16, #tpu.memory_space<vmem>>, vector<1x128x128xbf16>
    %78 = vector.shape_cast %77 : vector<1x128x128xbf16> to vector<128x128xbf16>
    %cst_58 = arith.constant dense<0.000000e+00> : vector<1x128xf32>
    %79 = tpu.matmul %76, %78, %cst_58 {dimension_numbers = #tpu.dot_dimension_numbers<[1], [0], [0], [1], [0, 0, 1, 1], [], []>} : vector<1x128xbf16>, vector<128x128xbf16>, vector<1x128xf32> -> vector<1x128xf32>
    %cst_59 = arith.constant 1.000000e-03 : f32
    %80 = vector.broadcast %cst_59 : f32 to vector<1x128xf32>
    %81 = arith.mulf %80, %79 : vector<1x128xf32>
    %82 = arith.maximumf %79, %81 : vector<1x128xf32>
    %83 = arith.truncf %82 : vector<1x128xf32> to vector<1x128xbf16>
    %c0_60 = arith.constant 0 : index
    %c0_61 = arith.constant 0 : index
    %84 = vector.load %arg7[%c0_60, %c0_61] : memref<128x128xbf16, #tpu.memory_space<vmem>>, vector<128x128xbf16>
    %cst_62 = arith.constant dense<0.000000e+00> : vector<1x128xf32>
    %85 = tpu.matmul %83, %84, %cst_62 {dimension_numbers = #tpu.dot_dimension_numbers<[1], [0], [0], [1], [0, 0, 1, 1], [], []>} : vector<1x128xbf16>, vector<128x128xbf16>, vector<1x128xf32> -> vector<1x128xf32>
    %86 = tpu.iota {dimensions = array<i32: 1>} : vector<1x128xi32>
    %c8_i32 = arith.constant 8 : i32
    %87 = vector.broadcast %c8_i32 : i32 to vector<1x128xi32>
    %88 = arith.cmpi slt, %86, %87 : vector<1x128xi32>
    %cst_63 = arith.constant -1.000000e+30 : f32
    %89 = vector.broadcast %cst_63 : f32 to vector<1x128xf32>
    %90 = arith.select %88, %85, %89 : vector<1x128xi1>, vector<1x128xf32>
    %cst_64 = arith.constant dense<0xFF800000> : vector<1xf32>
    %91 = vector.multi_reduction <maximumf>, %90, %cst_64 [1] : vector<1x128xf32> to vector<1xf32>
    %92 = vector.shape_cast %91 : vector<1xf32> to vector<1x1xf32>
    %93 = vector.broadcast %92 : vector<1x1xf32> to vector<1x128xf32>
    %94 = arith.subf %90, %93 : vector<1x128xf32>
    %95 = math.exp %94 : vector<1x128xf32>
    %cst_65 = arith.constant 0.000000e+00 : f32
    %96 = vector.broadcast %cst_65 : f32 to vector<1x128xf32>
    %97 = arith.select %88, %95, %96 : vector<1x128xi1>, vector<1x128xf32>
    %cst_66 = arith.constant dense<0.000000e+00> : vector<1xf32>
    %98 = vector.multi_reduction <add>, %97, %cst_66 [1] : vector<1x128xf32> to vector<1xf32>
    %99 = vector.shape_cast %98 : vector<1xf32> to vector<1x1xf32>
    %100 = vector.broadcast %99 : vector<1x1xf32> to vector<1x128xf32>
    %101 = arith.divf %97, %100 : vector<1x128xf32>
    %c0_67 = arith.constant 0 : index
    %c0_68 = arith.constant 0 : index
    %c0_69 = arith.constant 0 : index
    %102 = vector.load %arg8[%c0_67, %c0_68, %c0_69] : memref<1x1x128xf32, #tpu.memory_space<vmem>>, vector<1x1x128xf32>
    %103 = vector.shape_cast %102 : vector<1x1x128xf32> to vector<1x128xf32>
    %104 = vector.shape_cast %101 : vector<1x128xf32> to vector<1x1x128xf32>
    tpu.vector_store %arg8[%c0_67, %c0_68, %c0_69], %104 {strides = array<i32>} : memref<1x1x128xf32, #tpu.memory_space<vmem>>, vector<1x1x128xf32>,
    return
  }
  func.func @transform_0(%arg0: i32) -> (i32, i32, i32) {
    %c0_i32 = arith.constant 0 : i32
    %c0_i32_0 = arith.constant 0 : i32
    %c0_i32_1 = arith.constant 0 : i32
    return %arg0, %c0_i32, %c0_i32_0 : i32, i32, i32
  }
  func.func @transform_1(%arg0: i32) -> (i32, i32, i32) {
    %c0_i32 = arith.constant 0 : i32
    %c0_i32_0 = arith.constant 0 : i32
    %c0_i32_1 = arith.constant 0 : i32
    return %arg0, %c0_i32, %c0_i32_0 : i32, i32, i32
  }
  func.func @transform_2(%arg0: i32) -> (i32, i32, i32) {
    %c0_i32 = arith.constant 0 : i32
    %c0_i32_0 = arith.constant 0 : i32
    %c0_i32_1 = arith.constant 0 : i32
    %c0_i32_2 = arith.constant 0 : i32
    return %c0_i32, %c0_i32_0, %c0_i32_1 : i32, i32, i32
  }
  func.func @transform_3(%arg0: i32) -> (i32, i32, i32) {
    %c0_i32 = arith.constant 0 : i32
    %c0_i32_0 = arith.constant 0 : i32
    %c0_i32_1 = arith.constant 0 : i32
    %c0_i32_2 = arith.constant 0 : i32
    return %c0_i32, %c0_i32_0, %c0_i32_1 : i32, i32, i32
  }
  func.func @transform_4(%arg0: i32) -> (i32, i32, i32) {
    %c0_i32 = arith.constant 0 : i32
    %c0_i32_0 = arith.constant 0 : i32
    %c0_i32_1 = arith.constant 0 : i32
    %c0_i32_2 = arith.constant 0 : i32
    return %c0_i32, %c0_i32_0, %c0_i32_1 : i32, i32, i32
  }
  func.func @transform_5(%arg0: i32) -> (i32, i32, i32) {
    %c0_i32 = arith.constant 0 : i32
    %c0_i32_0 = arith.constant 0 : i32
    %c0_i32_1 = arith.constant 0 : i32
    %c0_i32_2 = arith.constant 0 : i32
    return %c0_i32, %c0_i32_0, %c0_i32_1 : i32, i32, i32
  }
  func.func @transform_6(%arg0: i32) -> (i32, i32) {
    %c0_i32 = arith.constant 0 : i32
    %c0_i32_0 = arith.constant 0 : i32
    %c0_i32_1 = arith.constant 0 : i32
    return %c0_i32, %c0_i32_0 : i32, i32
  }
  func.func @transform_7(%arg0: i32) -> (i32, i32, i32) {
    %c0_i32 = arith.constant 0 : i32
    %c0_i32_0 = arith.constant 0 : i32
    %c0_i32_1 = arith.constant 0 : i32
    return %arg0, %c0_i32, %c0_i32_0 : i32, i32, i32
  }
}

</mosaic_0001>

<bundles_post_ra>
// kernel: tpu_custom_call.1
= control target key start
LH: loop header
LB: loop body
LE: loop exit
PB: predicated region body
PF: predicated region fallthrough
CT: control target
= control target key end

     0   :  { %s3275_s0 = inlined_call_operand.hbm [shape: bf16[4,16,128], index: 0, kind: input, shape index: {}]   ;;  %s3276_s1 = inlined_call_operand.hbm [shape: bf16[4,16,16], index: 1, kind: input, shape index: {}]   ;;  %s3277_s2 = inlined_call_operand.hbm [shape: bf16[4,128,128], index: 2, kind: input, shape index: {}]   ;;  %s3278_s3 = inlined_call_operand.hbm [shape: bf16[4,128,128], index: 3, kind: input, shape index: {}]   ;;  %s3279_s4 = inlined_call_operand.vmem [shape: f32[4,1,128], index: 4, kind: input, shape index: {}]   ;;  %s3280_s5 = inlined_call_operand.hbm [shape: bf16[1,128,128], index: 5, kind: input, shape index: {}]   ;;  %s3281_s6 = inlined_call_operand.hbm [shape: bf16[128,128], index: 6, kind: input, shape index: {}]   ;;  %s3282_s7 = inlined_call_operand.hbm [shape: f32[4,1,128], index: 7, kind: output, shape index: {}]  }
   0x1   :  { %3291 = sst [smem:[#allocation21_spill]] %s3275_s0 }
   0x2   :  { %3292 = sst [smem:[#allocation22_spill]] %s3277_s2 }
   0x3   :  { %3293 = sst [smem:[#allocation23_spill]] %s3278_s3 }
   0x4   :  { %12 = vsyncpa [#allocation3], 0 }
   0x5   :  { %14 = vsyncpa [#allocation3 + $0x1], 0 }
   0x6   :  { %15 = vsyncpa [#allocation6], 0 }
   0x7   :  { %17 = vsyncpa [#allocation6 + $0x1], 0 }
   0x8   :  { %18 = vsyncpa [#allocation9], 0 }
   0x9   :  { %19 = vsyncpa [#allocation12], 0 }
   0xa   :  { %20 = vsyncpa [#allocation4], 0 }
   0xb   :  { %22 = vsyncpa [#allocation4 + $0x1], 0  ;;  %s2795_s24 = smov 0   ;;  %s2797_s25 = smov 0  }
   0xc   :  { %s2799_s26 = smov 0   ;;  %s2801_s27 = smov 0  }
   0xd LB: > { %s2816_s28 = sadd.s32 4294967295, %s2742_s27   ;;  %s1866_s29 = sadd.s32 4294967294, %s2742_s27   ;;  %s2742_s27 = sphi %s2801_s27, %s3321_s27   ;;  %s2738_s26 = sphi %s2799_s26, %s3320_s26   ;;  %s2734_s25 = sphi %s2797_s25, %s3319_s25   ;;  %s2730_s24 = sphi %s2795_s24, %s3318_s24  }
   0xe   : > { %p48_p0 = scmp.ne.s32.totalorder %s2734_s25, %s2730_s24  ;;  %p3283_p1 = scmp.eq.s32.totalorder %s2816_s28, 0 }
   0xf   : > { %p209_p3 = scmp.eq.s32.totalorder %s1866_s29, 3  ;;  %p1867_p5 = scmp.ge.s32.totalorder %s2742_s27, 1 }
  0x10   : > { %p2825_p4 = por %p3283_p1, %p48_p0  ;;  %p216_p7 = scmp.lt.s32.totalorder %s2742_s27, 5 }
  0x11   : > { %p2830_p6 = por %p209_p3, %p48_p0  ;;  %s2744_s10 = smov [#allocation7]  }
  0x12   : > { %s3294_s30 = scalar_select %p2825_p4, 1, 0 }
  0x13   : > { %s3295_s8 = scalar_select %p2830_p6, 1, 0 }
  0x14   : > { %p2835_p8 = pnand %p1867_p5, %p216_p7  ;;  %s228_s11 = sshll.u32 %s2744_s10, 4  ;;  %s2839_s11 = int_to_ptr.vmem [resolvable:$true] %s228_s11 }
  0x15   : > { %3296 = sst [smem:[#allocation20_spill]] %s3295_s8  ;;  %s2745_s13 = smov [#allocation8]  }
  0x16   : > { %s3297_s9 = scalar_select %p2835_p8, 1, 0 }
  0x17   : > { %p2328_p9 = pneg %p2835_p8  ;;  %s241_s14 = sshll.u32 %s2745_s13, 4  ;;  %s2849_s14 = int_to_ptr.vmem [resolvable:$true] %s241_s14 }
  0x18   : > { %s2746_s15 = smov [#allocation10]   ;;  %s3299_s2 = sld [smem:[#allocation22_spill]] }
  0x19   : > { %p2845_p10 = pnand %p2328_p9, %p3283_p1  ;;  %s2851_s16 = sshll.u32 %s2746_s15, 4  ;;  %s258_s16 = int_to_ptr.vmem [resolvable:$true] %s2851_s16 }
  0x1b   : > { %p2861_p12 = pneg %p2845_p10 }
  0x1e   : > { %s2488_s19 = scalar_lea.hbm %s3299_s2, 4096 }
  0x1f   : > { %p2489_p11 = scmp.ne.s32.totalorder %s3299_s2, %s2488_s19  ;;  %p2495_p3 = scmp.lt.u32.totalorder %s2488_s19, %s3299_s2 }
  0x21   : > { %p2491_p13 = pnand %p2861_p12, %p2489_p11 }
  0x23   : > { %p2492_p0 = pneg %p2491_p13 }
  0x25   : > { %p2497_p5 = pnand %p2495_p3, %p2492_p0 }
  0x27   : > { %2500 = shalt.err (!%p2497_p5)
}
  0x28   : > { %s2501_s10 = scalar_lea.vmem %s2839_s11, 4096  ;;  %p2509_p2 = scmp.lt.s32.totalorder %s2839_s11, %s2839_s11 }
  0x29   : > { %p2502_p7 = scmp.ne.s32.totalorder %s2839_s11, %s2501_s10  ;;  %p2510_p6 = scmp.lt.s32.totalorder %s2501_s10, %s2501_s10 }
  0x2b   : > { %p2504_p9 = pnand %p2502_p7, %p2861_p12  ;;  %p2511_p11 = por %p2510_p6, %p2509_p2 }
  0x2d   : > { %p2505_p1 = pneg %p2504_p9 }
  0x2f   : > { %p2512_p13 = pnand %p2511_p11, %p2505_p1 }
  0x31   : > { %2515 = shalt.err (!%p2512_p13)
}
  0x32   : > { %s3287_s13 = smov 64   ;;  %s3289_s15 = smov 4  }
  0x33   : > { %2331 = dma.hbm_to_vmem [thread:$0]  (!%p2845_p10), %s3299_s2, 4096, %s2839_s11, [#allocation6], %s3287_s13, %s3287_s13, %s3289_s15  }
  0x34   : > { %s3301_s3 = sld [smem:[#allocation23_spill]] }
  0x3a   : > { %s2516_s21 = scalar_lea.hbm %s3301_s3, 4096 }
  0x3b   : > { %p2517_p1 = scmp.ne.s32.totalorder %s3301_s3, %s2516_s21  ;;  %p2523_p0 = scmp.lt.u32.totalorder %s2516_s21, %s3301_s3 }
  0x3d   : > { %p2519_p2 = pnand %p2517_p1, %p2861_p12 }
  0x3f   : > { %p2520_p6 = pneg %p2519_p2 }
  0x41   : > { %p2525_p3 = pnand %p2523_p0, %p2520_p6 }
  0x43   : > { %2528 = shalt.err (!%p2525_p3)
}
  0x44   : > { %s2529_s11 = scalar_lea.vmem %s2849_s14, 4096  ;;  %p2537_p11 = scmp.lt.s32.totalorder %s2849_s14, %s2849_s14 }
  0x45   : > { %p2530_p5 = scmp.ne.s32.totalorder %s2849_s14, %s2529_s11  ;;  %p2538_p13 = scmp.lt.s32.totalorder %s2529_s11, %s2529_s11 }
  0x47   : > { %p2532_p7 = pnand %p2530_p5, %p2861_p12  ;;  %p2539_p1 = por %p2538_p13, %p2537_p11 }
  0x49   : > { %p2533_p9 = pneg %p2532_p7 }
  0x4b   : > { %p2540_p2 = pnand %p2539_p1, %p2533_p9 }
  0x4d   : > { %2543 = shalt.err (!%p2540_p2)
}
  0x4e   : > { %2334 = dma.hbm_to_vmem [thread:$0]  (!%p2845_p10), %s3301_s3, 4096, %s2849_s14, [#allocation9], %s3287_s13, %s3287_s13, %s3289_s15  }
  0x4f   : > { %s2544_s20 = scalar_lea.hbm %s3280_s5, 1024 }
  0x50   : > { %p2545_p6 = scmp.ne.s32.totalorder %s3280_s5, %s2544_s20  ;;  %p2551_p5 = scmp.lt.u32.totalorder %s2544_s20, %s3280_s5 }
  0x52   : > { %p2547_p0 = pnand %p2545_p6, %p2861_p12 }
  0x54   : > { %p2548_p3 = pneg %p2547_p0 }
  0x56   : > { %p2553_p7 = pnand %p2551_p5, %p2548_p3 }
  0x58   : > { %2556 = shalt.err (!%p2553_p7)
}
  0x59   : > { %s2557_s11 = scalar_lea.vmem %s258_s16, 1024  ;;  %p2565_p1 = scmp.lt.s32.totalorder %s258_s16, %s258_s16 }
  0x5a   : > { %p2558_p9 = scmp.ne.s32.totalorder %s258_s16, %s2557_s11  ;;  %p2566_p2 = scmp.lt.s32.totalorder %s2557_s11, %s2557_s11 }
  0x5c   : > { %p2560_p11 = pnand %p2558_p9, %p2861_p12  ;;  %p2567_p4 = por %p2566_p2, %p2565_p1 }
  0x5e   : > { %p2561_p13 = pneg %p2560_p11 }
  0x60   : > { %p2568_p8 = pnand %p2567_p4, %p2561_p13 }
  0x62   : > { %2571 = shalt.err (!%p2568_p8)
}
  0x63   : > { %2337 = dma.hbm_to_vmem [thread:$0]  (!%p2845_p10), %s3280_s5, 1024, %s258_s16, [#allocation9], %s3287_s13, %s3287_s13, %s3289_s15  }
  0x64   : > { %s2749_s17 = smov [#allocation11]   ;;  %s2572_s21 = scalar_lea.hbm %s3281_s6, 1024 }
  0x65   : > { %s270_s18 = sshll.u32 %s2749_s17, 4  ;;  %p2573_p4 = scmp.ne.s32.totalorder %s3281_s6, %s2572_s21  ;;  %s271_s18 = int_to_ptr.vmem [resolvable:$true] %s270_s18 }
  0x66   : > { %p2579_p0 = scmp.lt.u32.totalorder %s2572_s21, %s3281_s6 }
  0x67   : > { %p2575_p8 = pnand %p2573_p4, %p2861_p12 }
  0x69   : > { %p2576_p6 = pneg %p2575_p8 }
  0x6b   : > { %p2581_p3 = pnand %p2579_p0, %p2576_p6 }
  0x6d   : > { %2584 = shalt.err (!%p2581_p3)
}
  0x6e   : > { %s2585_s16 = scalar_lea.vmem %s271_s18, 1024  ;;  %p2593_p11 = scmp.lt.s32.totalorder %s271_s18, %s271_s18 }
  0x6f   : > { %p2586_p5 = scmp.ne.s32.totalorder %s271_s18, %s2585_s16  ;;  %p2594_p13 = scmp.lt.s32.totalorder %s2585_s16, %s2585_s16 }
  0x71   : > { %p2588_p7 = pnand %p2586_p5, %p2861_p12  ;;  %p2595_p1 = por %p2594_p13, %p2593_p11 }
  0x73   : > { %p2589_p9 = pneg %p2588_p7 }
  0x75   : > { %p2596_p2 = pnand %p2595_p1, %p2589_p9 }
  0x77   : > { %2599 = shalt.err (!%p2596_p2)
}
  0x78   : > { %2340 = dma.hbm_to_vmem [thread:$0]  (!%p2845_p10), %s3281_s6, 1024, %s271_s18, [#allocation12], %s3287_s13, %s3287_s13, %s3289_s15  }
  0x79   : > { %s2955_s22 = sadd.s32 1, %s2742_s27   ;;  %s35_s12 = sadd.s32 1, %s2738_s26 }
  0x7a   : > { %s32_s17 = ssub.s32 %s2742_s27, %s2955_s22  ;;  %p42_p12 = scmp.ne.s32.totalorder %s2738_s26, %s2734_s25 }
  0x7b   : > { %p33_p4 = scmp.eq.s32.totalorder %s32_s17, 0  ;;  %p43_p8 = scmp.eq.s32.totalorder %s2742_s27, 0 }
  0x7c   : > { %p3302_p6 = scmp.eq.s32.totalorder %s2816_s28, 3  ;;  %p2356_p3 = scmp.lt.s32.totalorder %s2742_s27, 4 }
  0x7d   : > { %s2971_s20 = scalar_select %p33_p4, %s2738_s26, %s35_s12  }
  0x7e   : > { %p2965_p0 = por %p3302_p6, %p42_p12  ;;  %p44_p5 = por %p43_p8, %p42_p12 }
  0x7f   : > { %s284_s21 = sand.u32 1, %s2738_s26   ;;  %s1982_s18 = sshll.u32 %s2742_s27, 7 }
  0x80   : > { %s1873_s23 = sshll.u32 %s284_s21, 3  ;;  %s3304_s0 = sld [smem:[#allocation21_spill]] }
  0x81   : > { %s288_s16 = scalar_lea.vmem [#allocation2], %s1873_s23  ;;  %p2982_p10 = pnand %p2356_p3, %p44_p5 }
  0x82   : > { %s295_s14 = sshll.u32 %s288_s16, 4  ;;  %s2989_s29 = scalar_lea.hbm %s3276_s1, %s1982_s18  ;;  %s2980_s14 = int_to_ptr.vmem [resolvable:$true] %s295_s14 }
  0x83   : > { %s309_s10 = scalar_lea.vmem [#allocation5], %s1873_s23  ;;  %s2993_s15 = scalar_lea.sflag [#allocation3], %s284_s21 }
  0x84   : > { %s2991_s13 = sshll.u32 %s309_s10, 4  ;;  %p2602_p9 = pneg %p2982_p10  ;;  %s3025_s13 = int_to_ptr.vmem [resolvable:$true] %s2991_s13 }
  0x86   : > { %s2978_s11 = scalar_lea.hbm %s3304_s0, %s1982_s18  ;;  %s2605_s12 = scalar_lea.hbm %s3304_s0, 512 }
  0x87   : > { %s2600_s16 = scalar_lea.hbm %s2978_s11, 128  ;;  %p2606_p1 = scmp.lt.u32.totalorder %s2978_s11, %s3304_s0 }
  0x88   : > { %p2601_p7 = scmp.ne.s32.totalorder %s2978_s11, %s2600_s16  ;;  %p2607_p2 = scmp.lt.u32.totalorder %s2605_s12, %s2600_s16 }
  0x89   : > { %p2609_p4 = scmp.lt.u32.totalorder %s2600_s16, %s2978_s11 }
  0x8a   : > { %p2603_p11 = pnand %p2602_p9, %p2601_p7  ;;  %p2608_p12 = por %p2607_p2, %p2606_p1 }
  0x8c   : > { %p2604_p13 = pneg %p2603_p11  ;;  %p2610_p8 = por %p2609_p4, %p2608_p12 }
  0x8e   : > { %p2611_p6 = pnand %p2610_p8, %p2604_p13 }
  0x90   : > { %2614 = shalt.err (!%p2611_p6)
}
  0x91   : > { %s2615_s21 = scalar_lea.vmem %s2980_s14, 128  ;;  %s2750_s2 = smov [#allocation2]  }
  0x92   : > { %p2616_p3 = scmp.ne.s32.totalorder %s2980_s14, %s2615_s21  ;;  %s2620_s3 = sshll.u32 %s2750_s2, 4  ;;  %s2621_s3 = int_to_ptr.vmem [resolvable:$false] %s2620_s3 }
  0x93   : > { %s2622_s23 = scalar_lea.vmem %s2621_s3, 256  ;;  %p2623_p11 = scmp.lt.s32.totalorder %s2980_s14, %s2621_s3 }
  0x94   : > { %p2618_p5 = pnand %p2616_p3, %p2602_p9  ;;  %p2624_p1 = scmp.lt.s32.totalorder %s2622_s23, %s2615_s21 }
  0x96   : > { %p2619_p7 = pneg %p2618_p5  ;;  %p2625_p2 = por %p2624_p1, %p2623_p11 }
  0x98   : > { %p2626_p12 = pnand %p2625_p2, %p2619_p7 }
  0x9a   : > { %2629 = shalt.err (!%p2626_p12)
}
  0x9b   : > { %s3306_s10 = smov 4   ;;  %s3307_s16 = smov 64  }
  0x9c   : > { %2344 = dma.hbm_to_vmem [thread:$0]  (!%p2982_p10), %s2978_s11, 128, %s2980_s14, %s2993_s15, %s3307_s16, %s3307_s16, %s3306_s10  }
  0x9d   : > { %s305_s12 = sand.u32 1, %s2742_s27   ;;  %s2630_s18 = scalar_lea.hbm %s2989_s29, 128 }
  0x9e   : > { %s3028_s17 = scalar_lea.sflag [#allocation6], %s305_s12  ;;  %p2631_p13 = scmp.ne.s32.totalorder %s2989_s29, %s2630_s18 }
  0x9f   : > { %s2635_s3 = scalar_lea.hbm %s3276_s1, 512  ;;  %p2636_p6 = scmp.lt.u32.totalorder %s2989_s29, %s3276_s1 }
  0xa0   : > { %p2633_p4 = pnand %p2631_p13, %p2602_p9  ;;  %p2637_p3 = scmp.lt.u32.totalorder %s2635_s3, %s2630_s18 }
  0xa1   : > { %p2639_p7 = scmp.lt.u32.totalorder %s2630_s18, %s2989_s29 }
  0xa2   : > { %p2634_p8 = pneg %p2633_p4  ;;  %p2638_p5 = por %p2637_p3, %p2636_p6 }
  0xa4   : > { %p2640_p11 = por %p2639_p7, %p2638_p5 }
  0xa6   : > { %p2641_p1 = pnand %p2640_p11, %p2634_p8 }
  0xa8   : > { %2644 = shalt.err (!%p2641_p1)
}
  0xa9   : > { %s2645_s15 = scalar_lea.vmem %s3025_s13, 128  ;;  %s2751_s11 = smov [#allocation5]  }
  0xaa   : > { %p2646_p2 = scmp.ne.s32.totalorder %s3025_s13, %s2645_s15  ;;  %s2650_s14 = sshll.u32 %s2751_s11, 4  ;;  %s2651_s14 = int_to_ptr.vmem [resolvable:$false] %s2650_s14 }
  0xab   : > { %s2652_s0 = scalar_lea.vmem %s2651_s14, 256  ;;  %p2653_p4 = scmp.lt.s32.totalorder %s3025_s13, %s2651_s14 }
  0xac   : > { %p2648_p12 = pnand %p2646_p2, %p2602_p9  ;;  %p2654_p6 = scmp.lt.s32.totalorder %s2652_s0, %s2645_s15 }
  0xae   : > { %p2649_p13 = pneg %p2648_p12  ;;  %p2655_p3 = por %p2654_p6, %p2653_p4 }
  0xb0   : > { %p2656_p5 = pnand %p2655_p3, %p2649_p13 }
  0xb2   : > { %2659 = shalt.err (!%p2656_p5)
}
  0xb3   : > { %2347 = dma.hbm_to_vmem [thread:$0]  (!%p2982_p10), %s2989_s29, 128, %s3025_s13, %s3028_s17, %s3307_s16, %s3307_s16, %s3306_s10  }
  0xb4   : > { %p3308_p9 = scmp.ne.s32.totalorder %s3297_s9, 0 }
  0xb5   : > { %s3060_s12 = sand.u32 (!%p3308_p9), 1, %s2734_s25   ;;  %p3309_p8 = scmp.ne.s32.totalorder (!%p3308_p9), %s3294_s30, 0 }
  0xb6   : > { %328 = sbr.rel (%p3308_p9) target bundleno = 2756 (0xac4), region = 48  ;;  %s1880_s18 = sshll.u32 (!%p3308_p9), %s3060_s12, 3 }
  0xb7   : > { %s331_s21 = scalar_lea.sflag (!%p3308_p9), [#allocation3], %s3060_s12  ;;  %s334_s2 = scalar_lea.vmem (!%p3308_p9), [#allocation2], %s1880_s18 }
  0xbd   : > { %2705 = dma.done.wait (%p3309_p8), %s331_s21, 128  }
  0xbe   : > { %2707 = vsyncadd (%p3309_p8), %s331_s21, 4294967168  ;;  %s339_s13 = sand.u32 1, %s2816_s28   ;;  %s343_s9 = scalar_lea.vmem [#allocation5], %s1880_s18 }
  0xbf   : > { %s340_s8 = scalar_lea.sflag [#allocation6], %s339_s13 }
  0xc0   : > { %2709 = dma.done.wait (%p3309_p8), %s340_s8, 128  }
  0xc1   : > { %2711 = vsyncadd (%p3309_p8), %s340_s8, 4294967168  ;;  %p3310_p10 = scmp.eq.s32.totalorder %s2816_s28, 0 }
  0xc3   : > { %2713 = dma.done.wait (%p3310_p10), [#allocation6], 4096   ;;  %p3311_p7 = pmov %p3310_p10 }
  0xc5   : > { %2715 = vsyncadd (%p3311_p7), [#allocation6], 4294963200  ;;  %p3312_p11 = pmov %p3311_p7 }
  0xc6   : > { %p3313_p1 = pmov %p3311_p7 }
  0xc7   : > { %2717 = dma.done.wait (%p3312_p11), [#allocation9], 5120  }
  0xc8   : > { %2719 = vsyncadd (%p3313_p1), [#allocation9], 4294962176  ;;  %p3314_p2 = pmov %p3313_p1 }
  0xc9   : > { %p3315_p12 = pmov %p3313_p1 }
  0xca   : > { %2721 = dma.done.wait (%p3314_p2), [#allocation12], 1024  }
  0xcb   : > { %2723 = vsyncadd (%p3315_p12), [#allocation12], 4294966272  ;;  %v2752_v0 = vmov 0.0   ;;  %vm2753_vm0 = vmmov 0   ;;  %v2402_v1 = vld [vmem:[%s334_s2] sm:$0xff]   ;;  %v3091_v2 = vld [vmem:[%s343_s9] sm:$0xff]  }
  0xcc   : > { %2082 = vmatprep.subr.bf16.mxu0 %v2752_v0  ;;  %2084 = vmatprep.mubr.msk.bf16.mxu0 %vm2753_vm0, %v2752_v0  ;;  %vm410_vm1 = vcmask 130048   ;;  %v2404_v3 = vld [vmem:[#allocation7] sm:$0xff]   ;;  %v2407_v5 = vld [vmem:[#allocation8 + $0x8] sm:$0xff]   ;;  %v2409_v7 = vld [vmem:[#allocation8 + $0x10] sm:$0xff]   ;;  %vm1712_vm3 = vcmask 1040384   ;;  %s1979_s11 = sshll.u32 %s2816_s28, 4 }
  0xcd   : > { %2088 = vmatprep.subr.bf16.mxu1 %v2752_v0  ;;  %2104 = vmatprep.mubr.msk.bf16.mxu1 %vm2753_vm0, %v2752_v0  ;;  %v2405_v4 = vld [vmem:[#allocation8] sm:$0xff]   ;;  %v2406_v6 = vld [vmem:[#allocation7 + $0x8] sm:$0xff]   ;;  %v2408_v8 = vld [vmem:[#allocation7 + $0x10] sm:$0xff]   ;;  %s393_s14 = scalar_lea.vmem [#allocation13], %s3060_s12  ;;  %s3232_s2 = scalar_lea.hbm %s3282_s7, %s1979_s11 }
  0xce   : > { %2083 = vmatpush3.bf16.msra.mxu0 %v2402_v1  ;;  %2089 = vmatpush3.bf16.msra.mxu1 %v2405_v4  ;;  %v2411_v9 = vld [vmem:[#allocation8 + $0x18] sm:$0xff]   ;;  %v2412_v11 = vld [vmem:[#allocation7 + $0x20] sm:$0xff]   ;;  %v2415_v13 = vld [vmem:[#allocation8 + $0x28] sm:$0xff]   ;;  %s1739_s0 = sshll.u32 %s393_s14, 4  ;;  %s1727_s13 = scalar_lea.sflag [#allocation4], %s3060_s12  ;;  %s3234_s0 = int_to_ptr.vmem [resolvable:$true] %s1739_s0 }
  0xcf   : > { %2108 = vmatprep.subr.bf16.mxu0 %v2752_v0  ;;  %2090 = vmatprep.subr.bf16.mxu1 %v2752_v0  ;;  %v2410_v10 = vld [vmem:[#allocation7 + $0x18] sm:$0xff]   ;;  %v2413_v12 = vld [vmem:[#allocation8 + $0x20] sm:$0xff]   ;;  %v2414_v14 = vld [vmem:[#allocation7 + $0x28] sm:$0xff]   ;;  %s2660_s8 = scalar_lea.vmem %s3234_s0, 16  ;;  %s2754_s28 = smov [#allocation13]  }
  0xd0   : > { %v2417_v15 = vld [vmem:[#allocation8 + $0x30] sm:$0xff]   ;;  %v2418_v17 = vld [vmem:[#allocation7 + $0x38] sm:$0xff]   ;;  %v2428_v28 = vld [vmem:[#allocation8 + $0x40] sm:$0xff]   ;;  %p2661_p13 = scmp.ne.s32.totalorder %s3234_s0, %s2660_s8  ;;  %s2664_s9 = sshll.u32 %s2754_s28, 4  ;;  %s2665_s9 = int_to_ptr.vmem [resolvable:$false] %s2664_s9 }
  0xd1   : > { %2085 = vmatmul.mubr.msk.bf16.vlgmr.msra.gmra.mrb[0].mxu0 %vm410_vm1, %v3091_v2  ;;  %v2416_v16 = vld [vmem:[#allocation7 + $0x30] sm:$0xff]   ;;  %v2419_v18 = vld [vmem:[#allocation8 + $0x38] sm:$0xff]   ;;  %v2429_v29 = vld [vmem:[#allocation8 + $0x48] sm:$0xff]   ;;  %s2666_s30 = scalar_lea.vmem %s2665_s9, 32  ;;  %p2667_p3 = scmp.lt.s32.totalorder %s3234_s0, %s2665_s9 }
  0xd2   : > { %2109 = vmatpush3.bf16.msra.mxu0 %v2404_v3  ;;  %2124 = vmatprep.mubr.msk.bf16.mxu0 %vm2753_vm0, %v2752_v0  ;;  %v2430_v30 = vld [vmem:[#allocation8 + $0x50] sm:$0xff]   ;;  %v2431_v31 = vld [vmem:[#allocation8 + $0x58] sm:$0xff]   ;;  %v2432_v32 = vld [vmem:[#allocation8 + $0x60] sm:$0xff]   ;;  %p2662_p4 = pnand %p2661_p13, %p2965_p0  ;;  %p2668_p5 = scmp.lt.s32.totalorder %s2666_s30, %s2660_s8 }
  0xd3   : > { %2110 = vmatprep.subr.bf16.mxu0 %v2752_v0  ;;  %2091 = vmatpush3.bf16.msra.mxu1 %v2407_v5  ;;  %v2433_v33 = vld [vmem:[#allocation8 + $0x68] sm:$0xff]   ;;  %v2434_v34 = vld [vmem:[#allocation8 + $0x70] sm:$0xff]   ;;  %v1905_v36 = vld [vmem:[%s3279_s4] ss:$0 sm:$0xff] }
  0xd4   : > { %2092 = vmatprep.subr.bf16.mxu1 %v2752_v0  ;;  %v2420_v49 = vld [vmem:[#allocation7 + $0x40] sm:$0xff]   ;;  %v2421_v50 = vld [vmem:[#allocation7 + $0x48] sm:$0xff]   ;;  %v2422_v51 = vld [vmem:[#allocation7 + $0x50] sm:$0xff]   ;;  %p2663_p6 = pneg %p2662_p4  ;;  %p2669_p9 = por %p2668_p5, %p2667_p3 }
  0xd5   : > { %v2423_v52 = vld [vmem:[#allocation7 + $0x58] sm:$0xff]   ;;  %v2424_v53 = vld [vmem:[#allocation7 + $0x60] sm:$0xff]   ;;  %v2425_v54 = vld [vmem:[#allocation7 + $0x68] sm:$0xff]  }
  0xd6   : > { %2111 = vmatpush3.bf16.msra.mxu0 %v2406_v6  ;;  %v2426_v55 = vld [vmem:[#allocation7 + $0x70] sm:$0xff]   ;;  %v2427_v56 = vld [vmem:[#allocation7 + $0x78] sm:$0xff]   ;;  %v2444_v5 = vld [vmem:[#allocation8 + $0x80] sm:$0xff]   ;;  %p2670_p8 = pnand %p2669_p9, %p2663_p6 }
  0xd7   : > { %2112 = vmatprep.subr.bf16.mxu0 %v2752_v0  ;;  %2093 = vmatpush3.bf16.msra.mxu1 %v2409_v7  ;;  %v2435_v57 = vld [vmem:[#allocation8 + $0x78] sm:$0xff]   ;;  %v2445_v6 = vld [vmem:[#allocation8 + $0x88] sm:$0xff]   ;;  %v2446_v7 = vld [vmem:[#allocation8 + $0x90] sm:$0xff]  }
  0xd8   : > { %2094 = vmatprep.subr.bf16.mxu1 %v2752_v0 }
  0xda   : > { %2113 = vmatpush3.bf16.msra.mxu0 %v2408_v8  ;;  %v2447_v8 = vld [vmem:[#allocation8 + $0x98] sm:$0xff]  }
  0xdb   : > { %2114 = vmatprep.subr.bf16.mxu0 %v2752_v0  ;;  %2095 = vmatpush3.bf16.msra.mxu1 %v2411_v9  ;;  %v2448_v9 = vld [vmem:[#allocation8 + $0xa0] sm:$0xff]  }
  0xdc   : > { %2096 = vmatprep.subr.bf16.mxu1 %v2752_v0 }
  0xde   : > { %2115 = vmatpush3.bf16.msra.mxu0 %v2410_v10  ;;  %v2449_v10 = vld [vmem:[#allocation8 + $0xa8] sm:$0xff]  }
  0xdf   : > { %2116 = vmatprep.subr.bf16.mxu0 %v2752_v0  ;;  %2097 = vmatpush3.bf16.msra.mxu1 %v2413_v12 }
  0xe0   : > { %2098 = vmatprep.subr.bf16.mxu1 %v2752_v0 }
  0xe2   : > { %2117 = vmatpush3.bf16.msra.mxu0 %v2412_v11  ;;  %v2450_v11 = vld [vmem:[#allocation8 + $0xb0] sm:$0xff]  }
  0xe3   : > { %2118 = vmatprep.subr.bf16.mxu0 %v2752_v0  ;;  %2099 = vmatpush3.bf16.msra.mxu1 %v2415_v13  ;;  %v1924_v13 = vld [vmem:[%s3279_s4 + $0x1] ss:$0 sm:$0xff] }
  0xe4   : > { %2100 = vmatprep.subr.bf16.mxu1 %v2752_v0 }
  0xe6   : > { %2119 = vmatpush3.bf16.msra.mxu0 %v2414_v14 }
  0xe7   : > { %2120 = vmatprep.subr.bf16.mxu0 %v2752_v0  ;;  %2101 = vmatpush3.bf16.msra.mxu1 %v2417_v15 }
  0xe8   : > { %2102 = vmatprep.subr.bf16.mxu1 %v2752_v0 }
  0xea   : > { %2121 = vmatpush3.bf16.msra.mxu0 %v2416_v16 }
  0xeb   : > { %2122 = vmatprep.subr.bf16.mxu0 %v2752_v0  ;;  %2103 = vmatpush3.bf16.msra.mxu1 %v2419_v18 }
  0xec   : > { %2128 = vmatprep.subr.bf16.mxu1 %v2752_v0 }
  0xee   : > { %2123 = vmatpush3.bf16.msra.mxu0 %v2418_v17 }
  0xef   : > { %2134 = vmatprep.subr.bf16.mxu0 %v2752_v0 }
  0xf1   : > { %2125 = vmatmul.mubr.bf16.vlgmr.msra.gmra.mrb[4].mxu0 %v2402_v1 }
  0xf2   : > { %2150 = vmatprep.mubr.msk.bf16.mxu0 %vm2753_vm0, %v2752_v0  ;;  %2135 = vmatpush3.bf16.msra.mxu0 %v2428_v28  ;;  %v2438_v28 = vld [vmem:[#allocation7 + $0x90] sm:$0xff]  }
  0xf3   : > { %2136 = vmatprep.subr.bf16.mxu0 %v2752_v0 }
  0xf6   : > { %2137 = vmatpush3.bf16.msra.mxu0 %v2429_v29  ;;  %v2439_v29 = vld [vmem:[#allocation7 + $0x98] sm:$0xff]  }
  0xf7   : > { %2138 = vmatprep.subr.bf16.mxu0 %v2752_v0 }
  0xfa   : > { %2139 = vmatpush3.bf16.msra.mxu0 %v2430_v30  ;;  %v2440_v30 = vld [vmem:[#allocation7 + $0xa0] sm:$0xff]  }
  0xfb   : > { %2140 = vmatprep.subr.bf16.mxu0 %v2752_v0 }
  0xfe   : > { %2141 = vmatpush3.bf16.msra.mxu0 %v2431_v31  ;;  %v2441_v31 = vld [vmem:[#allocation7 + $0xa8] sm:$0xff]  }
  0xff   : > { %2142 = vmatprep.subr.bf16.mxu0 %v2752_v0 }
 0x102   : > { %2143 = vmatpush3.bf16.msra.mxu0 %v2432_v32  ;;  %v2442_v32 = vld [vmem:[#allocation7 + $0xb0] sm:$0xff]  }
 0x103   : > { %2144 = vmatprep.subr.bf16.mxu0 %v2752_v0 }
 0x106   : > { %2145 = vmatpush3.bf16.msra.mxu0 %v2433_v33  ;;  %v2443_v33 = vld [vmem:[#allocation7 + $0xb8] sm:$0xff]  }
 0x107   : > { %2146 = vmatprep.subr.bf16.mxu0 %v2752_v0 }
 0x10a   : > { %2147 = vmatpush3.bf16.msra.mxu0 %v2434_v34  ;;  %v2451_v34 = vld [vmem:[#allocation8 + $0xb8] sm:$0xff]  }
 0x10b   : > { %2148 = vmatprep.subr.bf16.mxu0 %v2752_v0 }
 0x10e   : > { %2149 = vmatpush3.bf16.msra.mxu0 %v2435_v57 }
 0x10f   : > { %2174 = vmatprep.subr.bf16.mxu0 %v2752_v0 }
 0x1a4   : > { %v448_v19 = vpop.f32.mrb[0].mxu0 }
 0x1a5   : > { %v2086_v20 = vpop.f32.mrb[1].mxu0 }
 0x1a6   : > { %v451_v21 = vpop.f32.mrb[2].mxu0 }
 0x1a7   : > { %v455_v22 = vpack.c.bf16 %v451_v21, %v448_v19  ;;  %v2087_v23 = vpop.f32.mrb[3].mxu0 }
 0x1a9   : > { %2105 = vmatmul.mubr.bf16.vlgmr.msra.gmra.mrb[0].mxu1 %v455_v22 }
 0x1aa   : > { %2130 = vmatprep.mubr.msk.bf16.mxu1 %vm2753_vm0, %v2752_v0 }
 0x1c4   : > { %v659_v24 = vpop.f32.mrb[4].mxu0 }
 0x1c5   : > { %v2126_v25 = vpop.f32.mrb[5].mxu0 }
 0x1c6   : > { %v662_v26 = vpop.f32.mrb[6].mxu0 }
 0x1c7   : > { %v2127_v27 = vpop.f32.mrb[7].mxu0 }
 0x1c8   : > { %v2437_v27 = vld [vmem:[#allocation7 + $0x88] sm:$0xff]  }
 0x27c   : > { %v570_v35 = vpop.f32.mrb[0].mxu1 }
 0x27d   : > { %v660_v37 = vadd.f32 %v659_v24, %v570_v35  ;;  %v2106_v38 = vpop.f32.mrb[1].mxu1 }
 0x27e   : > { %v573_v39 = vpop.f32.mrb[2].mxu1 }
 0x27f   : > { %v673_v40 = vadd.f32 %v1905_v36, %v660_v37  ;;  %v663_v41 = vadd.f32 %v662_v26, %v573_v39  ;;  %v2107_v42 = vpop.f32.mrb[3].mxu1  ;;  %v2436_v26 = vld [vmem:[#allocation7 + $0x80] sm:$0xff]  }
 0x281   : > { %v675_v43 = vmul.f32 0.01, %v673_v40  ;;  %v674_v44 = vadd.f32 %v1905_v36, %v663_v41 }
 0x283   : > { %v676_v45 = vmul.f32 0.01, %v674_v44  ;;  %v677_v46 = vmax.f32 %v673_v40, %v675_v43 }
 0x285   : > { %v678_v47 = vmax.f32 %v674_v44, %v676_v45  ;;  %v2460_v44 = vld [vmem:[#allocation8 + $0xc0] sm:$0xff]   ;;  %v2461_v45 = vld [vmem:[#allocation8 + $0xc8] sm:$0xff]  }
 0x287   : > { %v679_v48 = vpack.c.bf16 %v678_v47, %v677_v46  ;;  %v2462_v46 = vld [vmem:[#allocation8 + $0xd0] sm:$0xff]   ;;  %v2463_v47 = vld [vmem:[#allocation8 + $0xd8] sm:$0xff]  }
 0x289   : > { %2129 = vmatpush3.bf16.msra.mxu1 %v679_v48 }
 0x28a   : > { %2154 = vmatprep.subr.bf16.mxu1 %v2752_v0 }
 0x28c   : > { %2131 = vmatmul.mubr.msk.bf16.vlgmr.msra.gmra.mrb[4].mxu1 %vm410_vm1, %v3091_v2 }
 0x28d   : > { %2155 = vmatpush3.bf16.msra.mxu1 %v2420_v49  ;;  %2170 = vmatprep.mubr.msk.bf16.mxu1 %vm2753_vm0, %v2752_v0  ;;  %v2465_v49 = vld [vmem:[#allocation8 + $0xe8] sm:$0xff]  }
 0x28e   : > { %2156 = vmatprep.subr.bf16.mxu1 %v2752_v0 }
 0x291   : > { %2157 = vmatpush3.bf16.msra.mxu1 %v2421_v50  ;;  %v2466_v50 = vld [vmem:[#allocation8 + $0xf0] sm:$0xff]  }
 0x292   : > { %2158 = vmatprep.subr.bf16.mxu1 %v2752_v0 }
 0x295   : > { %2159 = vmatpush3.bf16.msra.mxu1 %v2422_v51 }
 0x296   : > { %2160 = vmatprep.subr.bf16.mxu1 %v2752_v0 }
 0x299   : > { %2161 = vmatpush3.bf16.msra.mxu1 %v2423_v52  ;;  %v1943_v52 = vld [vmem:[%s3279_s4 + $0x2] ss:$0 sm:$0xff] }
 0x29a   : > { %2162 = vmatprep.subr.bf16.mxu1 %v2752_v0 }
 0x29d   : > { %2163 = vmatpush3.bf16.msra.mxu1 %v2424_v53 }
 0x29e   : > { %2164 = vmatprep.subr.bf16.mxu1 %v2752_v0 }
 0x2a1   : > { %2165 = vmatpush3.bf16.msra.mxu1 %v2425_v54 }
 0x2a2   : > { %2166 = vmatprep.subr.bf16.mxu1 %v2752_v0 }
 0x2a5   : > { %2167 = vmatpush3.bf16.msra.mxu1 %v2426_v55 }
 0x2a6   : > { %2168 = vmatprep.subr.bf16.mxu1 %v2752_v0 }
 0x2a9   : > { %2169 = vmatpush3.bf16.msra.mxu1 %v2427_v56 }
 0x2aa   : > { %2180 = vmatprep.subr.bf16.mxu1 %v2752_v0 }
 0x2ac   : > { %2171 = vmatmul.mubr.bf16.vlgmr.msra.gmra.mrb[8].mxu1 %v679_v48  ;;  %v2464_v48 = vld [vmem:[#allocation8 + $0xe0] sm:$0xff]  }
 0x2ad   : > { %2196 = vmatprep.mubr.msk.bf16.mxu1 %vm2753_vm0, %v2752_v0  ;;  %2181 = vmatpush3.bf16.msra.mxu1 %v2444_v5  ;;  %v2454_v5 = vld [vmem:[#allocation7 + $0xd0] sm:$0xff]  }
 0x2ae   : > { %2182 = vmatprep.subr.bf16.mxu1 %v2752_v0 }
 0x2b1   : > { %2183 = vmatpush3.bf16.msra.mxu1 %v2445_v6  ;;  %v2455_v6 = vld [vmem:[#allocation7 + $0xd8] sm:$0xff]  }
 0x2b2   : > { %2184 = vmatprep.subr.bf16.mxu1 %v2752_v0 }
 0x2b5   : > { %2185 = vmatpush3.bf16.msra.mxu1 %v2446_v7  ;;  %v2456_v7 = vld [vmem:[#allocation7 + $0xe0] sm:$0xff]  }
 0x2b6   : > { %2186 = vmatprep.subr.bf16.mxu1 %v2752_v0 }
 0x2b9   : > { %2187 = vmatpush3.bf16.msra.mxu1 %v2447_v8  ;;  %v2458_v8 = vld [vmem:[#allocation7 + $0xf0] sm:$0xff]  }
 0x2ba   : > { %2188 = vmatprep.subr.bf16.mxu1 %v2752_v0 }
 0x2bd   : > { %2189 = vmatpush3.bf16.msra.mxu1 %v2448_v9  ;;  %v2459_v9 = vld [vmem:[#allocation7 + $0xf8] sm:$0xff]  }
 0x2be   : > { %2190 = vmatprep.subr.bf16.mxu1 %v2752_v0 }
 0x2c1   : > { %2191 = vmatpush3.bf16.msra.mxu1 %v2449_v10  ;;  %v2467_v10 = vld [vmem:[#allocation8 + $0xf8] sm:$0xff]  }
 0x2c2   : > { %2192 = vmatprep.subr.bf16.mxu1 %v2752_v0 }
 0x2c5   : > { %2193 = vmatpush3.bf16.msra.mxu1 %v2450_v11 }
 0x2c6   : > { %2194 = vmatprep.subr.bf16.mxu1 %v2752_v0 }
 0x2c9   : > { %2195 = vmatpush3.bf16.msra.mxu1 %v2451_v34  ;;  %v2480_v34 = vld [vmem:[#allocation11 + $0x20] sm:$0xff]  }
 0x2ca   : > { %2220 = vmatprep.subr.bf16.mxu1 %v2752_v0 }
 0x35f   : > { %v714_v58 = vpop.f32.mrb[4].mxu1 }
 0x360   : > { %v2132_v59 = vpop.f32.mrb[5].mxu1 }
 0x361   : > { %v717_v60 = vpop.f32.mrb[6].mxu1 }
 0x362   : > { %v721_v61 = vpack.c.bf16 %v717_v60, %v714_v58  ;;  %v2133_v62 = vpop.f32.mrb[7].mxu1 }
 0x364   : > { %2151 = vmatmul.mubr.bf16.vlgmr.msra.gmra.mrb[8].mxu0 %v721_v61 }
 0x365   : > { %2176 = vmatprep.mubr.msk.bf16.mxu0 %vm2753_vm0, %v2752_v0 }
 0x37f   : > { %v927_v63 = vpop.f32.mrb[8].mxu1 }
 0x380   : > { %v2172_v1 = vpop.f32.mrb[9].mxu1 }
 0x381   : > { %v930_v3 = vpop.f32.mrb[10].mxu1 }
 0x382   : > { %v2173_v4 = vpop.f32.mrb[11].mxu1 }
 0x383   : > { %v2453_v4 = vld [vmem:[#allocation7 + $0xc8] sm:$0xff]  }
 0x437   : > { %v838_v12 = vpop.f32.mrb[8].mxu0 }
 0x438   : > { %v928_v14 = vadd.f32 %v927_v63, %v838_v12  ;;  %v2152_v15 = vpop.f32.mrb[9].mxu0 }
 0x439   : > { %v841_v16 = vpop.f32.mrb[10].mxu0 }
 0x43a   : > { %v942_v17 = vadd.f32 %v1924_v13, %v928_v14  ;;  %v931_v18 = vadd.f32 %v930_v3, %v841_v16  ;;  %v2153_v19 = vpop.f32.mrb[11].mxu0  ;;  %v2452_v3 = vld [vmem:[#allocation7 + $0xc0] sm:$0xff]  }
 0x43c   : > { %v944_v20 = vmul.f32 0.01, %v942_v17  ;;  %v943_v21 = vadd.f32 %v1924_v13, %v931_v18 }
 0x43e   : > { %v945_v22 = vmul.f32 0.01, %v943_v21  ;;  %v3156_v23 = vmax.f32 %v942_v17, %v944_v20  ;;  %v2468_v20 = vld [vmem:[#allocation10] sm:$0xff]  }
 0x440   : > { %v3158_v24 = vmax.f32 %v943_v21, %v945_v22  ;;  %v2469_v21 = vld [vmem:[#allocation10 + $0x8] sm:$0xff]   ;;  %v2470_v22 = vld [vmem:[#allocation10 + $0x10] sm:$0xff]  }
 0x442   : > { %v948_v25 = vpack.c.bf16 %v3158_v24, %v3156_v23 }
 0x444   : > { %2175 = vmatpush3.bf16.msra.mxu0 %v948_v25 }
 0x445   : > { %2200 = vmatprep.subr.bf16.mxu0 %v2752_v0 }
 0x447   : > { %2177 = vmatmul.mubr.msk.bf16.vlgmr.msra.gmra.mrb[12].mxu0 %vm410_vm1, %v3091_v2 }
 0x448   : > { %2201 = vmatpush3.bf16.msra.mxu0 %v2436_v26  ;;  %2216 = vmatprep.mubr.msk.bf16.mxu0 %vm2753_vm0, %v2752_v0  ;;  %v2472_v26 = vld [vmem:[#allocation10 + $0x20] sm:$0xff]  }
 0x449   : > { %2202 = vmatprep.subr.bf16.mxu0 %v2752_v0 }
 0x44c   : > { %2203 = vmatpush3.bf16.msra.mxu0 %v2437_v27  ;;  %v2473_v27 = vld [vmem:[#allocation10 + $0x28] sm:$0xff]  }
 0x44d   : > { %2204 = vmatprep.subr.bf16.mxu0 %v2752_v0 }
 0x450   : > { %2205 = vmatpush3.bf16.msra.mxu0 %v2438_v28  ;;  %v2474_v28 = vld [vmem:[#allocation10 + $0x30] sm:$0xff]  }
 0x451   : > { %2206 = vmatprep.subr.bf16.mxu0 %v2752_v0 }
 0x454   : > { %2207 = vmatpush3.bf16.msra.mxu0 %v2439_v29  ;;  %v2475_v29 = vld [vmem:[#allocation10 + $0x38] sm:$0xff]  }
 0x455   : > { %2208 = vmatprep.subr.bf16.mxu0 %v2752_v0 }
 0x458   : > { %2209 = vmatpush3.bf16.msra.mxu0 %v2440_v30  ;;  %v2476_v30 = vld [vmem:[#allocation11] sm:$0xff]  }
 0x459   : > { %2210 = vmatprep.subr.bf16.mxu0 %v2752_v0 }
 0x45c   : > { %2211 = vmatpush3.bf16.msra.mxu0 %v2441_v31  ;;  %v2477_v31 = vld [vmem:[#allocation11 + $0x8] sm:$0xff]  }
 0x45d   : > { %2212 = vmatprep.subr.bf16.mxu0 %v2752_v0 }
 0x460   : > { %2213 = vmatpush3.bf16.msra.mxu0 %v2442_v32  ;;  %v2478_v32 = vld [vmem:[#allocation11 + $0x10] sm:$0xff]  }
 0x461   : > { %2214 = vmatprep.subr.bf16.mxu0 %v2752_v0 }
 0x464   : > { %2215 = vmatpush3.bf16.msra.mxu0 %v2443_v33  ;;  %v2479_v33 = vld [vmem:[#allocation11 + $0x18] sm:$0xff]  }
 0x465   : > { %2226 = vmatprep.subr.bf16.mxu0 %v2752_v0 }
 0x467   : > { %2217 = vmatmul.mubr.bf16.vlgmr.msra.gmra.mrb[16].mxu0 %v948_v25  ;;  %v2471_v25 = vld [vmem:[#allocation10 + $0x18] sm:$0xff]  }
 0x468   : > { %2242 = vmatprep.mubr.msk.bf16.mxu0 %vm2753_vm0, %v2752_v0  ;;  %2227 = vmatpush3.bf16.msra.mxu0 %v2460_v44 }
 0x469   : > { %2228 = vmatprep.subr.bf16.mxu0 %v2752_v0 }
 0x46c   : > { %2229 = vmatpush3.bf16.msra.mxu0 %v2461_v45 }
 0x46d   : > { %2230 = vmatprep.subr.bf16.mxu0 %v2752_v0 }
 0x470   : > { %2231 = vmatpush3.bf16.msra.mxu0 %v2462_v46 }
 0x471   : > { %2232 = vmatprep.subr.bf16.mxu0 %v2752_v0 }
 0x474   : > { %2233 = vmatpush3.bf16.msra.mxu0 %v2463_v47 }
 0x475   : > { %2234 = vmatprep.subr.bf16.mxu0 %v2752_v0 }
 0x478   : > { %2235 = vmatpush3.bf16.msra.mxu0 %v2464_v48 }
 0x479   : > { %2236 = vmatprep.subr.bf16.mxu0 %v2752_v0 }
 0x47c   : > { %2237 = vmatpush3.bf16.msra.mxu0 %v2465_v49 }
 0x47d   : > { %2238 = vmatprep.subr.bf16.mxu0 %v2752_v0 }
 0x480   : > { %2239 = vmatpush3.bf16.msra.mxu0 %v2466_v50 }
 0x481   : > { %2240 = vmatprep.subr.bf16.mxu0 %v2752_v0 }
 0x484   : > { %2241 = vmatpush3.bf16.msra.mxu0 %v2467_v10 }
 0x485   : > { %2266 = vmatprep.subr.bf16.mxu0 %v2752_v0 }
 0x51a   : > { %v983_v35 = vpop.f32.mrb[12].mxu0 }
 0x51b   : > { %v2178_v36 = vpop.f32.mrb[13].mxu0 }
 0x51c   : > { %v986_v37 = vpop.f32.mrb[14].mxu0 }
 0x51d   : > { %v990_v38 = vpack.c.bf16 %v986_v37, %v983_v35  ;;  %v2179_v39 = vpop.f32.mrb[15].mxu0  ;;  %v2481_v35 = vld [vmem:[#allocation11 + $0x28] sm:$0xff]   ;;  %v1962_v37 = vld [vmem:[%s3279_s4 + $0x3] ss:$0 sm:$0xff] }
 0x51f   : > { %2197 = vmatmul.mubr.bf16.vlgmr.msra.gmra.mrb[12].mxu1 %v990_v38 }
 0x520   : > { %2222 = vmatprep.mubr.msk.bf16.mxu1 %vm2753_vm0, %v2752_v0 }
 0x53a   : > { %v1196_v40 = vpop.f32.mrb[16].mxu0 }
 0x53b   : > { %v2218_v41 = vpop.f32.mrb[17].mxu0 }
 0x53c   : > { %v1199_v42 = vpop.f32.mrb[18].mxu0 }
 0x53d   : > { %v2219_v43 = vpop.f32.mrb[19].mxu0 }
 0x5f2   : > { %v1107_v51 = vpop.f32.mrb[12].mxu1 }
 0x5f3   : > { %v1197_v53 = vadd.f32 %v1196_v40, %v1107_v51  ;;  %v2198_v54 = vpop.f32.mrb[13].mxu1 }
 0x5f4   : > { %v1110_v55 = vpop.f32.mrb[14].mxu1 }
 0x5f5   : > { %v1211_v56 = vadd.f32 %v1943_v52, %v1197_v53  ;;  %v1200_v57 = vadd.f32 %v1199_v42, %v1110_v55  ;;  %v2199_v58 = vpop.f32.mrb[15].mxu1 }
 0x5f7   : > { %v1213_v59 = vmul.f32 0.01, %v1211_v56  ;;  %v1212_v60 = vadd.f32 %v1943_v52, %v1200_v57 }
 0x5f9   : > { %v1214_v61 = vmul.f32 0.01, %v1212_v60  ;;  %v1215_v62 = vmax.f32 %v1211_v56, %v1213_v59 }
 0x5fb   : > { %v1216_v63 = vmax.f32 %v1212_v60, %v1214_v61  ;;  %v2482_v60 = vld [vmem:[#allocation11 + $0x30] sm:$0xff]   ;;  %v2483_v61 = vld [vmem:[#allocation11 + $0x38] sm:$0xff]  }
 0x5fd   : > { %v1217_v1 = vpack.c.bf16 %v1216_v63, %v1215_v62 }
 0x5ff   : > { %2221 = vmatpush3.bf16.msra.mxu1 %v1217_v1 }
 0x600   : > { %2246 = vmatprep.subr.bf16.mxu1 %v2752_v0 }
 0x602   : > { %2223 = vmatmul.mubr.msk.bf16.vlgmr.msra.gmra.mrb[16].mxu1 %vm410_vm1, %v3091_v2  ;;  %v2457_v2 = vld [vmem:[#allocation7 + $0xe8] sm:$0xff]  }
 0x603   : > { %2247 = vmatpush3.bf16.msra.mxu1 %v2452_v3  ;;  %2262 = vmatprep.mubr.msk.bf16.mxu1 %vm2753_vm0, %v2752_v0 }
 0x604   : > { %2248 = vmatprep.subr.bf16.mxu1 %v2752_v0 }
 0x607   : > { %2249 = vmatpush3.bf16.msra.mxu1 %v2453_v4 }
 0x608   : > { %2250 = vmatprep.subr.bf16.mxu1 %v2752_v0 }
 0x60b   : > { %2251 = vmatpush3.bf16.msra.mxu1 %v2454_v5  ;;  %v1708_v5 = vlaneseq }
 0x60c   : > { %2252 = vmatprep.subr.bf16.mxu1 %v2752_v0 }
 0x60f   : > { %2253 = vmatpush3.bf16.msra.mxu1 %v2455_v6  ;;  %v1709_v6 = vand.u32 127, %v1708_v5 }
 0x610   : > { %2254 = vmatprep.subr.bf16.mxu1 %v2752_v0 }
 0x611   : > { %vm1710_vm2 = vcmp.lt.s32.totalorder %v1709_v6, 8 }
 0x613   : > { %2255 = vmatpush3.bf16.msra.mxu1 %v2456_v7 }
 0x614   : > { %2256 = vmatprep.subr.bf16.mxu1 %v2752_v0 }
 0x617   : > { %2257 = vmatpush3.bf16.msra.mxu1 %v2457_v2 }
 0x618   : > { %2258 = vmatprep.subr.bf16.mxu1 %v2752_v0 }
 0x61b   : > { %2259 = vmatpush3.bf16.msra.mxu1 %v2458_v8 }
 0x61c   : > { %2260 = vmatprep.subr.bf16.mxu1 %v2752_v0 }
 0x61f   : > { %2261 = vmatpush3.bf16.msra.mxu1 %v2459_v9 }
 0x620   : > { %2286 = vmatprep.subr.bf16.mxu1 %v2752_v0 }
 0x622   : > { %2263 = vmatmul.mubr.bf16.vlgmr.msra.gmra.mrb[20].mxu1 %v1217_v1 }
 0x623   : > { %2302 = vmatprep.mubr.msk.bf16.mxu1 %vm2753_vm0, %v2752_v0  ;;  %2287 = vmatpush3.bf16.msra.mxu1 %v2476_v30 }
 0x624   : > { %2288 = vmatprep.subr.bf16.mxu1 %v2752_v0 }
 0x627   : > { %2289 = vmatpush3.bf16.msra.mxu1 %v2477_v31 }
 0x628   : > { %2290 = vmatprep.subr.bf16.mxu1 %v2752_v0 }
 0x62b   : > { %2291 = vmatpush3.bf16.msra.mxu1 %v2478_v32 }
 0x62c   : > { %2292 = vmatprep.subr.bf16.mxu1 %v2752_v0 }
 0x62f   : > { %2293 = vmatpush3.bf16.msra.mxu1 %v2479_v33 }
 0x630   : > { %2294 = vmatprep.subr.bf16.mxu1 %v2752_v0 }
 0x633   : > { %2295 = vmatpush3.bf16.msra.mxu1 %v2480_v34 }
 0x634   : > { %2296 = vmatprep.subr.bf16.mxu1 %v2752_v0 }
 0x637   : > { %2297 = vmatpush3.bf16.msra.mxu1 %v2481_v35 }
 0x638   : > { %2298 = vmatprep.subr.bf16.mxu1 %v2752_v0 }
 0x63b   : > { %2299 = vmatpush3.bf16.msra.mxu1 %v2482_v60 }
 0x63c   : > { %2300 = vmatprep.subr.bf16.mxu1 %v2752_v0 }
 0x63f   : > { %2301 = vmatpush3.bf16.msra.mxu1 %v2483_v61 }
 0x6d5   : > { %v1252_v11 = vpop.f32.mrb[16].mxu1 }
 0x6d6   : > { %v2224_v12 = vpop.f32.mrb[17].mxu1 }
 0x6d7   : > { %v1255_v13 = vpop.f32.mrb[18].mxu1 }
 0x6d8   : > { %v1259_v14 = vpack.c.bf16 %v1255_v13, %v1252_v11  ;;  %v2225_v15 = vpop.f32.mrb[19].mxu1 }
 0x6da   : > { %2243 = vmatmul.mubr.bf16.vlgmr.msra.gmra.mrb[20].mxu0 %v1259_v14 }
 0x6db   : > { %2282 = vmatprep.mubr.msk.bf16.mxu0 %vm2753_vm0, %v2752_v0  ;;  %2267 = vmatpush3.bf16.msra.mxu0 %v2468_v20 }
 0x6dc   : > { %2268 = vmatprep.subr.bf16.mxu0 %v2752_v0 }
 0x6df   : > { %2269 = vmatpush3.bf16.msra.mxu0 %v2469_v21 }
 0x6e0   : > { %2270 = vmatprep.subr.bf16.mxu0 %v2752_v0 }
 0x6e3   : > { %2271 = vmatpush3.bf16.msra.mxu0 %v2470_v22 }
 0x6e4   : > { %2272 = vmatprep.subr.bf16.mxu0 %v2752_v0 }
 0x6e7   : > { %2273 = vmatpush3.bf16.msra.mxu0 %v2471_v25 }
 0x6e8   : > { %2274 = vmatprep.subr.bf16.mxu0 %v2752_v0 }
 0x6eb   : > { %2275 = vmatpush3.bf16.msra.mxu0 %v2472_v26 }
 0x6ec   : > { %2276 = vmatprep.subr.bf16.mxu0 %v2752_v0 }
 0x6ef   : > { %2277 = vmatpush3.bf16.msra.mxu0 %v2473_v27 }
 0x6f0   : > { %2278 = vmatprep.subr.bf16.mxu0 %v2752_v0 }
 0x6f3   : > { %2279 = vmatpush3.bf16.msra.mxu0 %v2474_v28 }
 0x6f4   : > { %2280 = vmatprep.subr.bf16.mxu0 %v2752_v0 }
 0x6f5   : > { %v1465_v16 = vpop.f32.mrb[20].mxu1 }
 0x6f6   : > { %v2264_v17 = vpop.f32.mrb[21].mxu1 }
 0x6f7   : > { %v1468_v18 = vpop.f32.mrb[22].mxu1  ;;  %2281 = vmatpush3.bf16.msra.mxu0 %v2475_v29 }
 0x6f8   : > { %v2265_v19 = vpop.f32.mrb[23].mxu1 }
 0x7ad   : > { %v1376_v36 = vpop.f32.mrb[20].mxu0 }
 0x7ae   : > { %v1466_v38 = vadd.f32 %v1465_v16, %v1376_v36  ;;  %v2244_v39 = vpop.f32.mrb[21].mxu0 }
 0x7af   : > { %v1379_v40 = vpop.f32.mrb[22].mxu0 }
 0x7b0   : > { %v1480_v41 = vadd.f32 %v1962_v37, %v1466_v38  ;;  %v1469_v42 = vadd.f32 %v1468_v18, %v1379_v40  ;;  %v2245_v43 = vpop.f32.mrb[23].mxu0 }
 0x7b2   : > { %v1482_v44 = vmul.f32 0.01, %v1480_v41  ;;  %v1481_v45 = vadd.f32 %v1962_v37, %v1469_v42 }
 0x7b4   : > { %v1484_v46 = vmax.f32 %v1480_v41, %v1482_v44  ;;  %v1483_v47 = vmul.f32 0.01, %v1481_v45 }
 0x7b6   : > { %v1485_v48 = vmax.f32 %v1481_v45, %v1483_v47  ;;  %v1486_v49 = vadd.f32 %v1484_v46, %v3156_v23 }
 0x7b8   : > { %v1487_v50 = vadd.f32 %v1485_v48, %v3158_v24 }
 0x7ba   : > { %v1488_v51 = vadd.f32 %v1487_v50, %v1486_v49 }
 0x7bc   : > { %v1489_v52 = vrot.slane %v1488_v51, 4 }
 0x7be   : > { %v1490_v53 = vadd.f32 %v1489_v52, %v1488_v51 }
 0x7c0   : > { %v1491_v54 = vrot.slane %v1490_v53, 2 }
 0x7c2   : > { %v1492_v55 = vadd.f32 %v1491_v54, %v1490_v53 }
 0x7c4   : > { %v1493_v56 = vrot.slane %v1492_v55, 1 }
 0x7c6   : > { %v1494_v57 = vadd.f32 %v1493_v56, %v1492_v55 }
 0x7c8   : > { %v1495_v58 = vmul.f32 0.0625, %v1494_v57 }
 0x7ca   : > { %v1496_v59 = vpack.c.bf16 %v1495_v58, %v1495_v58 }
 0x7cc   : > { %2283 = vmatmul.mubr.bf16.vlgmr.msra.gmra.mrb[24].mxu0 %v1496_v59 }
 0x89f   : > { %v1595_v62 = vpop.f32.mrb[24].mxu0 }
 0x8a0   : > { %v1601_v23 = vmul.f32 0.001, %v1595_v62  ;;  %v2284_v63 = vpop.f32.mrb[25].mxu0 }
 0x8a1   : > { %v1598_v24 = vpop.f32.mrb[26].mxu0 }
 0x8a2   : > { %v1602_v1 = vmax.f32 %v1595_v62, %v1601_v23  ;;  %v2285_v3 = vpop.f32.mrb[27].mxu0 }
 0x8a4   : > { %v1603_v4 = vpack.c.bf16 %v1602_v1, %v1602_v1 }
 0x8a6   : > { %2303 = vmatmul.mubr.bf16.vlgmr.msra.gmra.mrb[24].mxu1 %v1603_v4 }
 0x979   : > { %v1702_v7 = vpop.f32.mrb[24].mxu1 }
 0x97a   : > { %v1711_v2 = vsel %vm1710_vm2, %v1702_v7, -1e+30  ;;  %v2304_v8 = vpop.f32.mrb[25].mxu1 }
 0x97b   : > { %v1705_v0 = vpop.f32.mrb[26].mxu1  ;;  %v1713_v9 = vsel %vm1712_vm3, %v1711_v2, -inf }
 0x97c   : > { %1714 = vmax.xlane.f32.xlu0 %v1713_v9  ;;  %v2305_v10 = vpop.f32.mrb[27].mxu1 }
 0xa09   : > { %v1715_v11 = vpop.xlane.xlu0 %1714 }
 0xa0a   : > { %v1716_v12 = vsub.f32 %v1711_v2, %v1715_v11 }
 0xa0c   : > { %v1717_v13 = vmul.f32 1.442695, %v1716_v12 }
 0xa0e   : > { %2484 = vpow2.f32 %v1717_v13 }
 0xa18   : > { %v2485_v14 = vpop.eup %2484 }
 0xa19   : > { %v1719_v15 = vsel %vm1710_vm2, %v2485_v14, 0.0 }
 0xa1a   : > { %v1720_v16 = vsel %vm1712_vm3, %v1719_v15, 0.0 }
 0xa1b   : > { %1721 = vadd.xlane.f32.xlu0 %v1720_v16 }
 0xaa8   : > { %v1722_v17 = vpop.xlane.xlu0 %1721 }
 0xaa9   : > { %2486 = vrcp.f32 %v1722_v17 }
 0xab3   : > { %v2487_v18 = vpop.eup %2486 }
 0xab4   : > { %v1724_v19 = vmul.f32 %v2487_v18, %v1719_v15 }
 0xab6   : > { %1725 = vst [vmem:[%s393_s14] sm:$0x1] %v1724_v19 }
 0xab7   : > { %2673 = shalt.err (!%p2670_p8)
}
 0xab8   : > { %s2674_s12 = scalar_lea.hbm %s3232_s2, 16  ;;  %s2678_s16 = scalar_lea.hbm %s3282_s7, 64 }
 0xab9   : > { %p2675_p10 = scmp.ne.s32.totalorder %s3232_s2, %s2674_s12  ;;  %p2679_p1 = scmp.lt.u32.totalorder %s3232_s2, %s3282_s7 }
 0xaba   : > { %p2680_p2 = scmp.lt.u32.totalorder %s2678_s16, %s2674_s12  ;;  %p2682_p13 = scmp.lt.u32.totalorder %s2674_s12, %s3232_s2 }
 0xabb   : > { %p2676_p7 = pnand %p2675_p10, %p2965_p0 }
 0xabc   : > { %p2681_p12 = por %p2680_p2, %p2679_p1 }
 0xabd   : > { %p2677_p11 = pneg %p2676_p7 }
 0xabe   : > { %p2683_p4 = por %p2682_p13, %p2681_p12 }
 0xac0   : > { %p2684_p6 = pnand %p2683_p4, %p2677_p11 }
 0xac2   : > { %2687 = shalt.err (!%p2684_p6)
}
 0xac3   : > { %2326 = dma.vmem_to_hbm [thread:$0]  (%p2965_p0), %s3234_s0, 16, %s3232_s2, %s1727_s13  }
 0xac4 PF: > { %s3316_s23 = sld [smem:[#allocation20_spill]]  ;;  %p2361_p3 = scmp.ge.s32.totalorder %s2742_s27, 2 }
 0xac5   : > { %s1751_s15 = sand.u32 1, %s2730_s24  }
 0xac6   : > { %s1752_s11 = scalar_lea.sflag [#allocation4], %s1751_s15 }
 0xaca   : > { %p3317_p5 = scmp.ne.s32.totalorder %s3316_s23, 0 }
 0xacc   : > { %p2349_p9 = pnand %p2361_p3, %p3317_p5 }
 0xace   : > { %2725 = dma.done.wait (!%p2349_p9), %s1752_s11, 16  }
 0xacf   : > { %2727 = vsyncadd (!%p2349_p9), %s1752_s11, 4294967280  ;;  %p25_p8 = scmp.ge.s32.totalorder %s2955_s22, 6   ;;  %s3318_s24 = smov %s2734_s25 }
 0xad0   : > { %s3319_s25 = smov %s2738_s26  ;;  %s3320_s26 = smov %s2971_s20 }
 0xad1   : > { %s3321_s27 = smov %s2955_s22  ;;  %27 = sbr.rel (!%p25_p8) target bundleno = 13 (0xd), region = 131 }
 0xad8   :  { %1756 = vsyncpa [#allocation3], 1 }
 0xad9   :  { %1758 = vsyncpa [#allocation3 + $0x1], 1 }
 0xada   :  { %1759 = vsyncpa [#allocation6], 1 }
 0xadb   :  { %1761 = vsyncpa [#allocation6 + $0x1], 1 }
 0xadc   :  { %1762 = vsyncpa [#allocation9], 1 }
 0xadd   :  { %1763 = vsyncpa [#allocation12], 1 }
 0xade   :  { %1764 = vsyncpa [#allocation4], 1 }
 0xadf   :  { %1766 = vsyncpa [#allocation4 + $0x1], 1 }

</bundles_post_ra>
